<compile_context>
chip_gen: v7x
topology: tpu7x:2x2x1
jax: 0.10.0
libtpu: 0.0.40
codegen_flags: <defaults>
</compile_context>

<pallas_src>
import functools

import jax
import jax.numpy as jnp
from jax import lax
from jax.experimental import pallas as pl
from jax.experimental.pallas import tpu as pltpu

_LANES = 128
_CHUNK = 1024                      # lanes cast+reduced per unrolled step
_MAX_TILE_S = 16 * _CHUNK          # caps the static unroll at 16 chunks
_SPLIT_BYTES = 4 * 1024 * 1024     # split a single row block above this size


def _target_block_bytes():
    """Generation-aware input-block byte target (double-buffered by Pallas)."""
    try:
        kind = jax.devices()[0].device_kind.lower()
    except Exception:  # pragma: no cover - defensive, keeps wrapper traceable
        kind = ""
    if "v7" in kind:               # v7x: 64 MiB physical VMEM per TC
        return 6 * 1024 * 1024
    return 8 * 1024 * 1024         # v5e / v6e: 128 MiB physical


def _row_sum_f32(x_ref, *, tile_s, s_base, s_total, needs_mask):
    """Sum the lane axis of x_ref (rows, tile_s) in f32, casting chunk-wise.

    The input block stays in its native dtype in VMEM; only one chunk at a time
    is promoted to f32.  `s_base` is the traced global lane offset of the block
    (used to zero out-of-range tail lanes when S is not a multiple of tile_s).
    """
    rows = x_ref.shape[0]

    def load(lo, width):
        x = x_ref[:, lo:lo + width].astype(jnp.float32)
        if needs_mask:
            lane = lax.broadcasted_iota(jnp.int32, (rows, width), 1)
            x = jnp.where(s_base + lo + lane < s_total, x, 0.0)
        return x

    n_full = tile_s // _CHUNK
    rem = tile_s - n_full * _CHUNK

    if n_full == 0:
        return jnp.sum(load(0, tile_s), axis=-1)

    # Statically bounded unroll (tile_s <= _MAX_TILE_S -> <= 16 chunks); each
    # chunk is reduced immediately so only a (rows,) f32 accumulator stays live.
    row_sum = jnp.sum(load(0, _CHUNK), axis=-1)
    for c in range(1, n_full):
        row_sum = row_sum + jnp.sum(load(c * _CHUNK, _CHUNK), axis=-1)
    if rem:
        row_sum = row_sum + jnp.sum(load(n_full * _CHUNK, rem), axis=-1)
    return row_sum


def _gap_kernel(x_ref, o_ref, acc_ref, *, inv_s, tile_s, s_total, needs_mask):
    """Accumulate row sums of (tile_rows, tile_s) blocks; finalize to mean."""
    j = pl.program_id(1)

    @pl.when(j == 0)
    def _init():
        acc_ref[...] = jnp.zeros_like(acc_ref)

    rows = x_ref.shape[0]
    part = _row_sum_f32(x_ref, tile_s=tile_s, s_base=j * tile_s,
                        s_total=s_total, needs_mask=needs_mask)
    acc_ref[...] += part.reshape(1, rows)

    @pl.when(j == pl.num_programs(1) - 1)
    def _finalize():
        o_ref[...] = (acc_ref[...] * inv_s).astype(o_ref.dtype)


def _choose_tiles(n_rows, spatial, itemsize, target_bytes):
    """Pick (tile_rows, tile_s): byte-bounded blocks, 128-multiple row tiles."""
    # Widest spatial slice such that a 128-row block still fits the byte target.
    max_row_elems = max(_CHUNK, target_bytes // (_LANES * itemsize))

    if spatial <= min(_MAX_TILE_S, max_row_elems):
        tile_s = spatial                          # common case: full S per block
    else:
        tile_s = min(_MAX_TILE_S, (max_row_elems // _CHUNK) * _CHUNK)
        tile_s = max(tile_s, _CHUNK)

    rows_budget = max(1, target_bytes // (tile_s * itemsize))
    if n_rows <= _LANES:
        tile_rows = n_rows
    else:
        tile_rows = min(n_rows, rows_budget)
        tile_rows = max(_LANES, (tile_rows // _LANES) * _LANES)

    # Ensure >=2 row blocks on big inputs so v7x can shard across both TCs.
    if (tile_rows >= n_rows and n_rows >= 2 * _LANES
            and n_rows * spatial * itemsize >= _SPLIT_BYTES):
        half = (n_rows + 1) // 2
        tile_rows = ((half + _LANES - 1) // _LANES) * _LANES

    return tile_rows, tile_s


def lambda_module_forward(x):
    """Pallas implementation of LambdaModule(lambda x: x.mean(dim=(-2, -1)))."""
    B, C, H, W = x.shape
    R, S = B * C, H * W

    # Lane-dense 2-D view: reduce axis (H*W) becomes the last (lane) dim.
    x2 = x.reshape(R, S)

    target = _target_block_bytes()
    tile_rows, tile_s = _choose_tiles(R, S, x.dtype.itemsize, target)
    grid = (pl.cdiv(R, tile_rows), pl.cdiv(S, tile_s))
    needs_mask = (S % tile_s) != 0

    kernel = functools.partial(
        _gap_kernel,
        inv_s=1.0 / float(S),
        tile_s=tile_s,
        s_total=S,
        needs_mask=needs_mask,
    )

    out = pl.pallas_call(
        kernel,
        out_shape=jax.ShapeDtypeStruct((1, R), x.dtype),
        grid=grid,
        in_specs=[pl.BlockSpec((tile_rows, tile_s), lambda i, j: (i, j))],
        out_specs=pl.BlockSpec((1, tile_rows), lambda i, j: (0, i)),
        scratch_shapes=[pltpu.VMEM((1, tile_rows), jnp.float32)],
        compiler_params=pltpu.CompilerParams(
            # Rows are embarrassingly parallel (megacore on v7x); the spatial
            # axis carries the VMEM accumulator so it must stay "arbitrary".
            dimension_semantics=("parallel", "arbitrary"),
            vmem_limit_bytes=32 * 1024 * 1024,
        ),
    )(x2)

    return out.reshape(B, C)


if __name__ == "__main__":
    key = jax.random.PRNGKey(0)
    k1, k2, k3 = jax.random.split(key, 3)

    # Small case (matches the module's typical toy usage): single-block path.
    B, C, H, W = 2, 4, 16, 16
    x_small = jax.random.normal(k1, (B, C, H, W), dtype=jnp.float32)
    out_small = jax.block_until_ready(lambda_module_forward(x_small))
    ref_small = jnp.mean(x_small, axis=(-2, -1))
    assert out_small.shape == (B, C)
    assert jnp.allclose(out_small, ref_small, atol=1e-5, rtol=1e-5)

    # Larger bf16 case: exercises the lane-dense, byte-bounded block path with
    # f32 accumulation of a bf16-resident block.
    B2, C2, H2, W2 = 4, 512, 16, 16
    x_big = jax.random.normal(k2, (B2, C2, H2, W2), dtype=jnp.bfloat16)
    out_big = jax.block_until_ready(lambda_module_forward(x_big))
    ref_big = jnp.mean(x_big.astype(jnp.float32), axis=(-2, -1))
    assert out_big.shape == (B2, C2)
    assert jnp.allclose(out_big.astype(jnp.float32), ref_big, atol=1e-2, rtol=1e-2)

    # Large-spatial case: exercises the 2-D grid (spatial chunks + f32 VMEM
    # accumulator) and the partial-tail lane mask (S not a multiple of tile_s).
    B3, C3, H3, W3 = 1, 4, 100, 200
    x_wide = jax.random.normal(k3, (B3, C3, H3, W3), dtype=jnp.float32)
    out_wide = jax.block_until_ready(lambda_module_forward(x_wide))
    ref_wide = jnp.mean(x_wide, axis=(-2, -1))
    assert out_wide.shape == (B3, C3)
    assert jnp.allclose(out_wide, ref_wide, atol=1e-5, rtol=1e-4)

    print("KERNEL_OK")
</pallas_src>

<mosaic_0001>
module attributes {stable_mosaic.version = 11 : i64} {
  func.func @_gap_kernel(%arg0: i32, %arg1: i32, %arg2: memref<8x256xf32, #tpu.memory_space<vmem>>, %arg3: memref<1x8xf32, #tpu.memory_space<vmem>>, %arg4: memref<1x8xf32, #tpu.memory_space<vmem>>) attributes {dimension_semantics = [#tpu.dimension_semantics<parallel>, #tpu.dimension_semantics<arbitrary>], iteration_bounds = array<i64: 1, 1>, scalar_prefetch = 0 : i64, scratch_operands = 1 : i64, tpu.core_type = #tpu.core_type<tc>, window_params = [{transform_indices = @transform_0, window_bounds = array<i64: 8, 256>}, {transform_indices = @transform_1, window_bounds = array<i64: 1, 8>}]} {
    %c0_i32 = arith.constant 0 : i32
    %0 = arith.cmpi eq, %arg1, %c0_i32 : i32
    %1 = arith.extui %0 : i1 to i32
    %c0_i32_0 = arith.constant 0 : i32
    %2 = arith.cmpi ne, %1, %c0_i32_0 : i32
    scf.if %2 {
      %cst_8 = arith.constant 0.000000e+00 : f32
      %12 = vector.broadcast %cst_8 : f32 to vector<1x8xf32>
      %c0_9 = arith.constant 0 : index
      %c0_10 = arith.constant 0 : index
      %13 = vector.load %arg4[%c0_9, %c0_10] : memref<1x8xf32, #tpu.memory_space<vmem>>, vector<1x8xf32>
      tpu.vector_store %arg4[%c0_9, %c0_10], %12 {strides = array<i32>} : memref<1x8xf32, #tpu.memory_space<vmem>>, vector<1x8xf32>,
    } else {
    }
    %c0 = arith.constant 0 : index
    %c0_1 = arith.constant 0 : index
    %3 = vector.load %arg2[%c0, %c0_1] : memref<8x256xf32, #tpu.memory_space<vmem>>, vector<8x256xf32>
    %cst = arith.constant dense<0.000000e+00> : vector<8xf32>
    %4 = vector.multi_reduction <add>, %3, %cst [1] : vector<8x256xf32> to vector<8xf32>
    %c0_2 = arith.constant 0 : index
    %c0_3 = arith.constant 0 : index
    %5 = vector.load %arg4[%c0_2, %c0_3] : memref<1x8xf32, #tpu.memory_space<vmem>>, vector<1x8xf32>
    %6 = vector.shape_cast %4 : vector<8xf32> to vector<1x8xf32>
    %7 = arith.addf %5, %6 : vector<1x8xf32>
    %c0_4 = arith.constant 0 : index
    %c0_5 = arith.constant 0 : index
    %8 = vector.load %arg4[%c0_4, %c0_5] : memref<1x8xf32, #tpu.memory_space<vmem>>, vector<1x8xf32>
    tpu.vector_store %arg4[%c0_4, %c0_5], %7 {strides = array<i32>} : memref<1x8xf32, #tpu.memory_space<vmem>>, vector<1x8xf32>,
    %c0_i32_6 = arith.constant 0 : i32
    %9 = arith.cmpi eq, %arg1, %c0_i32_6 : i32
    %10 = arith.extui %9 : i1 to i32
    %c0_i32_7 = arith.constant 0 : i32
    %11 = arith.cmpi ne, %10, %c0_i32_7 : i32
    scf.if %11 {
      %c0_8 = arith.constant 0 : index
      %c0_9 = arith.constant 0 : index
      %12 = vector.load %arg4[%c0_8, %c0_9] : memref<1x8xf32, #tpu.memory_space<vmem>>, vector<1x8xf32>
      %cst_10 = arith.constant 3.906250e-03 : f32
      %13 = vector.broadcast %cst_10 : f32 to vector<1x8xf32>
      %14 = arith.mulf %12, %13 : vector<1x8xf32>
      %c0_11 = arith.constant 0 : index
      %c0_12 = arith.constant 0 : index
      %15 = vector.load %arg3[%c0_11, %c0_12] : memref<1x8xf32, #tpu.memory_space<vmem>>, vector<1x8xf32>
      tpu.vector_store %arg3[%c0_11, %c0_12], %14 {strides = array<i32>} : memref<1x8xf32, #tpu.memory_space<vmem>>, vector<1x8xf32>,
    } else {
    }
    return
  }
  func.func @transform_0(%arg0: i32, %arg1: i32) -> (i32, i32) {
    %c0_i32 = arith.constant 0 : i32
    return %arg0, %arg1 : i32, i32
  }
  func.func @transform_1(%arg0: i32, %arg1: i32) -> (i32, i32) {
    %c0_i32 = arith.constant 0 : i32
    %c0_i32_0 = arith.constant 0 : i32
    return %c0_i32, %arg0 : i32, i32
  }
}

</mosaic_0001>

<bundles_post_ra>
// kernel: tpu_custom_call.1
= control target key start
LH: loop header
LB: loop body
LE: loop exit
PB: predicated region body
PF: predicated region fallthrough
CT: control target
= control target key end

     0   :  { %6 = vsyncpa [#allocation4], 0  ;;  %s259_s0 = inlined_call_operand.hbm [shape: f32[8,256], index: 0, kind: input, shape index: {}]   ;;  %s260_s1 = inlined_call_operand.hbm [shape: f32[1,8], index: 1, kind: output, shape index: {}]  }
   0x1   :  { %7 = vsyncpa [#allocation5], 0  ;;  %s217_s6 = smov [#allocation3]   ;;  %s169_s10 = scalar_lea.hbm %s259_s0, 256 }
   0x2   :  { %s14_s7 = sshll.u32 %s217_s6, 4  ;;  %p170_p0 = scmp.ne.s32.totalorder %s259_s0, %s169_s10  ;;  %s15_s7 = int_to_ptr.vmem [resolvable:$true] %s14_s7 }
   0x3   :  { %p173_p1 = scmp.lt.u32.totalorder %s169_s10, %s259_s0 }
   0x5   :  { %p175_p2 = pnand %p173_p1, %p170_p0 }
   0x7   :  { %178 = shalt.err (!%p175_p2)
}
   0x8   :  { %s179_s15 = scalar_lea.vmem %s15_s7, 256  ;;  %p184_p4 = scmp.lt.s32.totalorder %s15_s7, %s15_s7 }
   0x9   :  { %p180_p3 = scmp.ne.s32.totalorder %s15_s7, %s179_s15  ;;  %p185_p5 = scmp.lt.s32.totalorder %s179_s15, %s179_s15 }
   0xb   :  { %p186_p6 = por %p185_p5, %p184_p4 }
   0xd   :  { %p187_p7 = pnand %p186_p6, %p180_p3 }
   0xf   :  { %190 = shalt.err (!%p187_p7)
}
  0x10   :  { %17 = dma.hbm_to_vmem [thread:$0]  %s259_s0, 256, %s15_s7, [#allocation4]  }
  0x11   :  { %213 = dma.done.wait [#allocation4], 256  }
  0x12   :  { %214 = vsyncadd [#allocation4], 4294967040  ;;  %v27_v0 = vld [vmem:[#allocation3] sm:$0xff]  ;;  %v28_v1 = vld [vmem:[#allocation3 + $0x8] sm:$0xff]  ;;  %v218_v3 = vmov 0   ;;  %v34_v4 = vlaneseq  ;;  %vm25_vm0 = vcmask 57344  }
  0x13   :  { %v29_v2 = vadd.f32 %v28_v1, %v27_v0  ;;  %168 = vset.pattern.permute.xlu0 %v218_v3  ;;  %v219_v8 = vmov 1966171168   ;;  %v220_v42 = vmov 0.0   ;;  %s221_s0 = smov [#allocation6]  }
  0x14   :  { %v35_v5 = vshrl.u32 %v34_v4, 7  ;;  %v119_v6 = vand.u32 127, %v34_v4  ;;  %v71_v9 = vunpack.c.l.s4 %v219_v8  ;;  %26 = vst.msk [vmem:[#allocation2] sm:$0x1] %vm25_vm0, %v220_v42  ;;  %s154_s18 = sshll.u32 %s221_s0, 4  ;;  %s155_s18 = int_to_ptr.vmem [resolvable:$true] %s154_s18 }
  0x15   :  { %30 = vadd.xlane.f32.xlu0 %v29_v2  ;;  %s191_s19 = scalar_lea.vmem %s155_s18, 16  ;;  %s195_s20 = scalar_lea.vmem %s155_s18, 32 }
  0x16   :  { %v122_v7 = vsub.s32 %v119_v6, %v35_v5  ;;  %v72_v10 = vunpack.c.0.s8 %v71_v9  ;;  %v36_v11 = vsub.s32 0, %v35_v5  ;;  %v40_v12 = vsub.s32 1, %v35_v5  ;;  %p192_p8 = scmp.ne.s32.totalorder %s155_s18, %s191_s19  ;;  %p196_p9 = scmp.lt.s32.totalorder %s155_s18, %s155_s18 }
  0x17   :  { %v44_v13 = vsub.s32 2, %v35_v5  ;;  %v48_v14 = vsub.s32 3, %v35_v5  ;;  %v52_v15 = vsub.s32 4, %v35_v5  ;;  %v56_v16 = vsub.s32 5, %v35_v5  ;;  %p197_p10 = scmp.lt.s32.totalorder %s195_s20, %s191_s19 }
  0x18   :  { %v60_v17 = vsub.s32 6, %v35_v5  ;;  %v64_v18 = vsub.s32 7, %v35_v5  ;;  %v75_v20 = vsub.s32 %v72_v10, %v35_v5 }
  0x19   :  { %p198_p11 = por %p197_p10, %p196_p9 }
  0x1b   :  { %v32_v46 = vld [vmem:[#allocation2] sm:$0x1]  ;;  %p199_p12 = pnand %p198_p11, %p192_p8 }
  0xa2   :  { %v31_v19 = vpop.xlane.xlu0 %30 }
  0xa3   :  { %v37_v21 = vrot.slane %v31_v19, %v36_v11  ;;  %v41_v22 = vrot.slane %v31_v19, %v40_v12  ;;  %v45_v23 = vrot.slane %v31_v19, %v44_v13  ;;  %v49_v24 = vrot.slane %v31_v19, %v48_v14 }
  0xa4   :  { %v53_v25 = vrot.slane %v31_v19, %v52_v15  ;;  %v57_v26 = vrot.slane %v31_v19, %v56_v16  ;;  %v61_v27 = vrot.slane %v31_v19, %v60_v17  ;;  %v65_v28 = vrot.slane %v31_v19, %v64_v18 }
  0xa5   :  { %v66_v29 = vcombine.low %v37_v21, %v41_v22  ;;  %v67_v30 = vcombine.low %v45_v23, %v49_v24 }
  0xa6   :  { %v68_v31 = vcombine.low %v53_v25, %v57_v26  ;;  %v69_v32 = vcombine.low %v61_v27, %v65_v28 }
  0xa7   :  { %v76_v33 = vrot.slane %v66_v29, %v75_v20  ;;  %v83_v34 = vrot.slane %v67_v30, %v75_v20 }
  0xa8   :  { %v90_v35 = vrot.slane %v68_v31, %v75_v20  ;;  %v97_v36 = vrot.slane %v69_v32, %v75_v20 }
  0xa9   :  { %v98_v37 = vcombine.low %v76_v33, %v83_v34 }
  0xaa   :  { %v99_v38 = vcombine.low %v90_v35, %v97_v36 }
  0xab   :  { %v106_v39 = vrot.slane %v98_v37, %v75_v20 }
  0xac   :  { %v113_v40 = vrot.slane %v99_v38, %v75_v20 }
  0xae   :  { %v114_v41 = vcombine.low %v106_v39, %v113_v40 }
  0xb0   :  { %116 = vperm.xlu0 %168, %v114_v41  }
 0x12f   :  { %v117_v43 = vpop.permute.xlu0 %116 }
 0x130   :  { %v123_v44 = vrot.slane %v117_v43, %v122_v7 }
 0x132   :  { %v130_v45 = vrot.slane %v123_v44, %v75_v20 }
 0x134   :  { %v137_v47 = vrot.slane %v130_v45, %v75_v20 }
 0x136   :  { %v139_v48 = vadd.f32 %v137_v47, %v32_v46 }
 0x138   :  { %141 = vst.msk [vmem:[#allocation2] sm:$0x1] %vm25_vm0, %v139_v48 }
 0x13f   :  { %v145_v49 = vld [vmem:[#allocation2] sm:$0x1] }
 0x140   :  { %v146_v50 = vmul.f32 0.00390625, %v145_v49 }
 0x142   :  { %147 = vst.msk [vmem:[#allocation6] sm:$0x1] %vm25_vm0, %v146_v50 }
 0x143   :  { %202 = shalt.err (!%p199_p12)
}
 0x144   :  { %s203_s23 = scalar_lea.hbm %s260_s1, 16 }
 0x145   :  { %p204_p13 = scmp.ne.s32.totalorder %s260_s1, %s203_s23  ;;  %p207_p0 = scmp.lt.u32.totalorder %s203_s23, %s260_s1 }
 0x147   :  { %p209_p1 = pnand %p207_p0, %p204_p13 }
 0x149   :  { %212 = shalt.err (!%p209_p1)
}
 0x14a   :  { %157 = dma.vmem_to_hbm [thread:$0]  %s155_s18, 16, %s260_s1, [#allocation5]  }
 0x14b   :  { %215 = dma.done.wait [#allocation5], 16  }
 0x14c   :  { %216 = vsyncadd [#allocation5], 4294967280 }
 0x14d   :  { %161 = vsyncpa [#allocation4], 1 }
 0x14e   :  { %162 = vsyncpa [#allocation5], 1 }

</bundles_post_ra>
